<compile_context>
chip_gen: v6e
topology: v6e:2x2x1
jax: 0.10.0
libtpu: 0.0.40
codegen_flags: <defaults>
</compile_context>

<pallas_src>
import jax
import jax.numpy as jnp
from jax import lax
from jax.experimental import pallas as pl
from jax.experimental.pallas import tpu as pltpu


def _round_up(v, m):
    return (v + m - 1) // m * m


def _cdiv(a, b):
    return -(-a // b)


def _vmem_capacity_bytes():
    # Generation-aware: 128 MiB on v5e/v6e, 64 MiB per TensorCore on v7x.
    try:
        return int(pltpu.get_tpu_info().vmem_capacity_bytes)
    except Exception:
        return 64 * 1024 * 1024  # conservative (v7x-sized) fallback


def _vmem_limit_bytes():
    cap = _vmem_capacity_bytes()
    return max(32 * 1024 * 1024, min(cap - 16 * 1024 * 1024, 100 * 1024 * 1024))


def _pick_tiles(k, n, tm_cap=512):
    """Choose (tm_cap, tk, tn) sized against the chip's VMEM.

    Tiles are 'balanced': padded dims split into near-equal aligned blocks,
    shrinking caps only until the double-buffered footprint fits the budget.
    """
    vmem_cap = _vmem_capacity_bytes()
    budget = min(vmem_cap // 2, 48 * 1024 * 1024)

    kp = _round_up(k, 128)
    np_ = _round_up(n, 128)
    tk_cap, tn_cap = 2048, 1024

    def balanced(dim, cap, align):
        nblk = _cdiv(dim, cap)
        return min(_round_up(_cdiv(dim, nblk), align), _round_up(dim, align))

    while True:
        tk = balanced(kp, tk_cap, 128)
        tn = balanced(np_, tn_cap, 128)
        # double-buffered x / w / bias input tiles + output tile (+ f32 acc headroom)
        fp = 4 * (2 * (tm_cap * tk + tn * tk + tn) + 3 * (tm_cap * tn))
        if fp <= budget:
            break
        if tk_cap > 512:
            tk_cap //= 2
        elif tn_cap > 256:
            tn_cap //= 2
        elif tm_cap > 128:
            tm_cap //= 2
        elif tk_cap > 128:
            tk_cap //= 2
        elif tn_cap > 128:
            tn_cap //= 2
        else:
            break
    return tm_cap, tk, tn


def _linear_kernel_f32(x_ref, w_ref, b_ref, o_ref):
    # f32 output: accumulate directly into the VMEM-resident output tile
    # (same output block index across the K grid axis), folding the bias into
    # the k == 0 init.  No scratch accumulator, no finalize copy.
    @pl.when(pl.program_id(2) == 0)
    def _init():
        o_ref[...] = jnp.broadcast_to(b_ref[...], o_ref.shape)

    o_ref[...] += lax.dot_general(
        x_ref[...],
        w_ref[...],
        dimension_numbers=(((1,), (1,)), ((), ())),   # contract Din of both (x @ W.T)
        preferred_element_type=jnp.float32,
    )


def _linear_kernel_acc(x_ref, w_ref, b_ref, o_ref, acc_ref):
    # General path (non-f32 outputs): f32 scratch accumulator + finalize cast.
    @pl.when(pl.program_id(2) == 0)
    def _init():
        acc_ref[...] = jnp.zeros_like(acc_ref)

    acc_ref[...] += lax.dot_general(
        x_ref[...],
        w_ref[...],
        dimension_numbers=(((1,), (1,)), ((), ())),
        preferred_element_type=jnp.float32,
    )

    @pl.when(pl.program_id(2) == pl.num_programs(2) - 1)
    def _finalize():
        o_ref[...] = (acc_ref[...] + b_ref[...].astype(jnp.float32)).astype(o_ref.dtype)


def _linear_pallas(x, wp, bp, n_out, tm_cap, tk, tn):
    """x: [m, k] (unpadded); wp: [np_, kp] pre-padded weight; bp: [1, np_]."""
    m, k = x.shape
    np_, kp = wp.shape

    # Balanced M tiling (multiple of 8 sublanes), pad x rows + K once per call.
    m8 = _round_up(m, 8)
    n_m_blocks = _cdiv(m8, tm_cap)
    tm = _round_up(_cdiv(m8, n_m_blocks), 8)
    mp = n_m_blocks * tm
    if (mp, kp) != (m, k):
        x = jnp.pad(x, ((0, mp - m), (0, kp - k)))   # padded K contributes zeros

    # v7x megacore: if the whole output is a single (i, j) block, halve tn so
    # the "parallel" j axis has 2 blocks (both TensorCores get work).  tn stays
    # a multiple of 128 and still divides the pre-padded np_.
    if mp // tm == 1 and np_ // tn == 1 and tn % 256 == 0:
        tn //= 2

    grid = (mp // tm, np_ // tn, kp // tk)

    out_dtype = x.dtype
    use_f32 = out_dtype == jnp.float32
    kernel = _linear_kernel_f32 if use_f32 else _linear_kernel_acc
    scratch = [] if use_f32 else [pltpu.VMEM((tm, tn), jnp.float32)]

    itemsize = jnp.dtype(out_dtype).itemsize
    cost = pl.CostEstimate(
        flops=2 * mp * kp * np_,
        transcendentals=0,
        bytes_accessed=(mp * kp + np_ * kp + np_ + mp * np_) * itemsize,
    )

    out = pl.pallas_call(
        kernel,
        out_shape=jax.ShapeDtypeStruct((mp, np_), out_dtype),
        grid_spec=pltpu.PrefetchScalarGridSpec(
            num_scalar_prefetch=0,
            grid=grid,
            in_specs=[
                pl.BlockSpec((tm, tk), lambda i, j, kk: (i, kk)),   # x rows / K-slice
                pl.BlockSpec((tn, tk), lambda i, j, kk: (j, kk)),   # weight [Dout, Din]
                pl.BlockSpec((1, tn), lambda i, j, kk: (0, j)),     # bias
            ],
            out_specs=pl.BlockSpec((tm, tn), lambda i, j, kk: (i, j)),
            scratch_shapes=scratch,
        ),
        compiler_params=pltpu.CompilerParams(
            dimension_semantics=("parallel", "parallel", "arbitrary"),
            vmem_limit_bytes=_vmem_limit_bytes(),
        ),
        cost_estimate=cost,
    )(x, wp, bp)

    if (mp, np_) != (m, n_out):
        out = out[:m, :n_out]
    return out


def make_custom_linear(weight, bias, *, tm_cap=512):
    """Setup stage mirroring CustomLinear.__init__.

    Pads the static weight/bias ONCE to the chosen tile multiples (no per-call
    jnp.pad HBM traffic for parameters) and returns forward(x, adj).
    """
    n, k = weight.shape
    tm_cap, tk, tn = _pick_tiles(k, n, tm_cap)
    kp = _round_up(k, tk)
    np_ = _round_up(n, tn)
    wp = weight if (np_, kp) == (n, k) else jnp.pad(weight, ((0, np_ - n), (0, kp - k)))
    bp = (bias if np_ == n else jnp.pad(bias, (0, np_ - n))).reshape(1, np_)

    def forward(x, adj=None, *, force_pallas=False):
        del adj  # unused by the reference forward pass
        m = x.shape[0]
        # Small problems: XLA's fused GEMM wins (launch + pad + grid overhead
        # dominates below a few MFLOPs).
        if not force_pallas and (2 * m * k * n) < (8 << 20):
            return (x @ weight.T + bias).astype(x.dtype)
        return _linear_pallas(x, wp, bp, n, tm_cap, tk, tn)

    return forward


def custom_linear(x, weight, bias, adj=None, *, force_pallas=False):
    """One-shot convenience wrapper (pads parameters per call; prefer
    make_custom_linear when the layer is applied repeatedly)."""
    return make_custom_linear(weight, bias)(x, adj, force_pallas=force_pallas)


if __name__ == "__main__":
    key = jax.random.PRNGKey(0)
    k1, k2, k3, k4, k5, k6, k7 = jax.random.split(key, 7)

    # ---- tiny shape matching the reference test module (N=8, 32 -> 16) ----
    N0, DIN0, DOUT0 = 8, 32, 16
    x0 = jax.random.normal(k1, (N0, DIN0), dtype=jnp.float32)
    adj0 = jax.random.normal(k2, (N0, N0), dtype=jnp.float32)   # unused, as in reference
    bound0 = 1.0 / (DIN0 ** 0.5)
    w0 = jax.random.uniform(k3, (DOUT0, DIN0), jnp.float32, minval=-bound0, maxval=bound0)
    b0 = jax.random.uniform(k4, (DOUT0,), jnp.float32, minval=-bound0, maxval=bound0)

    ref0 = x0 @ w0.T + b0
    lin0 = make_custom_linear(w0, b0)
    y0 = jax.block_until_ready(lin0(x0, adj0))                        # jnp fast path
    y0_pallas = jax.block_until_ready(lin0(x0, adj0, force_pallas=True))  # padded Pallas path
    assert y0.shape == (N0, DOUT0)
    assert jnp.allclose(y0, ref0, atol=1e-5, rtol=1e-5)
    assert jnp.allclose(y0_pallas, ref0, atol=1e-4, rtol=1e-4)

    # ---- larger shape exercising the tiled, pipelined kernel ----
    N1, DIN1, DOUT1 = 256, 1024, 512
    x1 = jax.random.normal(k5, (N1, DIN1), dtype=jnp.float32)
    bound1 = 1.0 / (DIN1 ** 0.5)
    w1 = jax.random.uniform(k6, (DOUT1, DIN1), jnp.float32, minval=-bound1, maxval=bound1)
    b1 = jax.random.uniform(k7, (DOUT1,), jnp.float32, minval=-bound1, maxval=bound1)

    lin1 = make_custom_linear(w1, b1)
    y1 = jax.block_until_ready(lin1(x1))
    ref1 = jnp.dot(x1, w1.T, precision=lax.Precision.HIGHEST) + b1
    assert y1.shape == (N1, DOUT1)
    assert jnp.allclose(y1, ref1, atol=1e-3, rtol=1e-3)

    # Convenience one-shot wrapper path.
    y1b = jax.block_until_ready(custom_linear(x1, w1, b1))
    assert jnp.allclose(y1b, ref1, atol=1e-3, rtol=1e-3)

    print("KERNEL_OK")
</pallas_src>

<mosaic_0001>
module attributes {stable_mosaic.version = 11 : i64} {
  func.func @_linear_kernel_f32(%arg0: i32, %arg1: i32, %arg2: i32, %arg3: memref<8x128xf32, #tpu.memory_space<vmem>>, %arg4: memref<128x128xf32, #tpu.memory_space<vmem>>, %arg5: memref<1x128xf32, #tpu.memory_space<vmem>>, %arg6: memref<8x128xf32, #tpu.memory_space<vmem>>) attributes {dimension_semantics = [#tpu.dimension_semantics<parallel>, #tpu.dimension_semantics<parallel>, #tpu.dimension_semantics<arbitrary>], iteration_bounds = array<i64: 1, 1, 1>, scalar_prefetch = 0 : i64, scratch_operands = 0 : i64, tpu.core_type = #tpu.core_type<tc>, window_params = [{transform_indices = @transform_0, window_bounds = array<i64: 8, 128>}, {transform_indices = @transform_1, window_bounds = array<i64: 128, 128>}, {transform_indices = @transform_2, window_bounds = array<i64: 1, 128>}, {transform_indices = @transform_3, window_bounds = array<i64: 8, 128>}]} {
    %c0_i32 = arith.constant 0 : i32
    %0 = arith.cmpi eq, %arg2, %c0_i32 : i32
    %1 = arith.extui %0 : i1 to i32
    %c0_i32_0 = arith.constant 0 : i32
    %2 = arith.cmpi ne, %1, %c0_i32_0 : i32
    scf.if %2 {
      %c0_8 = arith.constant 0 : index
      %c0_9 = arith.constant 0 : index
      %9 = vector.load %arg5[%c0_8, %c0_9] : memref<1x128xf32, #tpu.memory_space<vmem>>, vector<1x128xf32>
      %10 = vector.shape_cast %9 : vector<1x128xf32> to vector<1x128xf32>
      %11 = vector.broadcast %10 : vector<1x128xf32> to vector<8x128xf32>
      %c0_10 = arith.constant 0 : index
      %c0_11 = arith.constant 0 : index
      %12 = vector.load %arg6[%c0_10, %c0_11] : memref<8x128xf32, #tpu.memory_space<vmem>>, vector<8x128xf32>
      tpu.vector_store %arg6[%c0_10, %c0_11], %11 {strides = array<i32>} : memref<8x128xf32, #tpu.memory_space<vmem>>, vector<8x128xf32>,
    } else {
    }
    %c0 = arith.constant 0 : index
    %c0_1 = arith.constant 0 : index
    %3 = vector.load %arg6[%c0, %c0_1] : memref<8x128xf32, #tpu.memory_space<vmem>>, vector<8x128xf32>
    %c0_2 = arith.constant 0 : index
    %c0_3 = arith.constant 0 : index
    %4 = vector.load %arg3[%c0_2, %c0_3] : memref<8x128xf32, #tpu.memory_space<vmem>>, vector<8x128xf32>
    %c0_4 = arith.constant 0 : index
    %c0_5 = arith.constant 0 : index
    %5 = vector.load %arg4[%c0_4, %c0_5] : memref<128x128xf32, #tpu.memory_space<vmem>>, vector<128x128xf32>
    %cst = arith.constant dense<0.000000e+00> : vector<8x128xf32>
    %6 = tpu.matmul %4, %5, %cst {dimension_numbers = #tpu.dot_dimension_numbers<[1], [1], [0], [0], [0, 0, 1, 0], [], []>} : vector<8x128xf32>, vector<128x128xf32>, vector<8x128xf32> -> vector<8x128xf32>
    %7 = arith.addf %3, %6 : vector<8x128xf32>
    %c0_6 = arith.constant 0 : index
    %c0_7 = arith.constant 0 : index
    %8 = vector.load %arg6[%c0_6, %c0_7] : memref<8x128xf32, #tpu.memory_space<vmem>>, vector<8x128xf32>
    tpu.vector_store %arg6[%c0_6, %c0_7], %7 {strides = array<i32>} : memref<8x128xf32, #tpu.memory_space<vmem>>, vector<8x128xf32>,
    return
  }
  func.func @transform_0(%arg0: i32, %arg1: i32, %arg2: i32) -> (i32, i32) {
    %c0_i32 = arith.constant 0 : i32
    return %arg0, %arg2 : i32, i32
  }
  func.func @transform_1(%arg0: i32, %arg1: i32, %arg2: i32) -> (i32, i32) {
    %c0_i32 = arith.constant 0 : i32
    return %arg1, %arg2 : i32, i32
  }
  func.func @transform_2(%arg0: i32, %arg1: i32, %arg2: i32) -> (i32, i32) {
    %c0_i32 = arith.constant 0 : i32
    %c0_i32_0 = arith.constant 0 : i32
    return %c0_i32, %arg1 : i32, i32
  }
  func.func @transform_3(%arg0: i32, %arg1: i32, %arg2: i32) -> (i32, i32) {
    %c0_i32 = arith.constant 0 : i32
    return %arg0, %arg1 : i32, i32
  }
}

</mosaic_0001>

<bundles_post_ra>
// kernel: tpu_custom_call.1
= control target key start
LH: loop header
LB: loop body
LE: loop exit
PB: predicated region body
PF: predicated region fallthrough
CT: control target
= control target key end

     0   :  { %8 = vsyncpa [#allocation3], 0  ;;  %s324_s0 = inlined_call_operand.hbm [shape: f32[8,128], index: 0, kind: input, shape index: {}]   ;;  %s325_s1 = inlined_call_operand.hbm [shape: f32[128,128], index: 1, kind: input, shape index: {}]   ;;  %s326_s2 = inlined_call_operand.vmem [shape: f32[1,128], index: 2, kind: input, shape index: {}]   ;;  %s327_s3 = inlined_call_operand.hbm [shape: f32[8,128], index: 3, kind: output, shape index: {}]  }
   0x1   :  { %9 = vsyncpa [#allocation6], 0 }
   0x2   :  { %10 = vsyncpa [#allocation4], 0  ;;  %s285_s12 = smov [#allocation2]   ;;  %s286_s14 = smov [#allocation5]  }
   0x3   :  { %s17_s13 = sshll.u32 %s285_s12, 4  ;;  %s26_s15 = sshll.u32 %s286_s14, 4  ;;  %s18_s13 = int_to_ptr.vmem [resolvable:$true] %s17_s13  ;;  %s27_s15 = int_to_ptr.vmem [resolvable:$true] %s26_s15 }
   0x4   :  { %s227_s16 = scalar_lea.vmem %s18_s13, 128  ;;  %p232_p1 = scmp.lt.s32.totalorder %s18_s13, %s18_s13 }
   0x5   :  { %p228_p0 = scmp.ne.s32.totalorder %s18_s13, %s227_s16  ;;  %p233_p2 = scmp.lt.s32.totalorder %s227_s16, %s227_s16 }
   0x7   :  { %p234_p3 = por %p233_p2, %p232_p1 }
   0x9   :  { %p235_p4 = pnand %p234_p3, %p228_p0 }
   0xb   :  { %238 = shalt.err (!%p235_p4)
}
   0xc   :  { %20 = dma.hbm_to_vmem [thread:$0]  %s324_s0, 128, %s18_s13, [#allocation3]  }
   0xd   :  { %s247_s19 = scalar_lea.vmem %s27_s15, 2048  ;;  %p252_p6 = scmp.lt.s32.totalorder %s27_s15, %s27_s15 }
   0xe   :  { %p248_p5 = scmp.ne.s32.totalorder %s27_s15, %s247_s19  ;;  %p253_p7 = scmp.lt.s32.totalorder %s247_s19, %s247_s19 }
  0x10   :  { %p254_p8 = por %p253_p7, %p252_p6 }
  0x12   :  { %p255_p9 = pnand %p254_p8, %p248_p5 }
  0x14   :  { %258 = shalt.err (!%p255_p9)
}
  0x15   :  { %s287_s20 = smov 128   ;;  %s288_s21 = smov 8  }
  0x16   :  { %32 = dma.hbm_to_vmem [thread:$0]  %s325_s1, 2048, %s27_s15, [#allocation6], %s287_s20, %s287_s20, %s288_s21  }
  0x17   :  { %279 = dma.done.wait [#allocation3], 128  }
  0x18   :  { %280 = vsyncadd [#allocation3], 4294967168 }
  0x19   :  { %281 = dma.done.wait [#allocation6], 2048  }
  0x1a   :  { %282 = vsyncadd [#allocation6], 4294965248  ;;  %v289_v0 = vmov 0.0   ;;  %vm290_vm0 = vmmov 0   ;;  %v70_v1 = vld [vmem:[#allocation5 + $0x78] sm:$0xff]  ;;  %v69_v2 = vld [vmem:[#allocation5 + $0x70] sm:$0xff] }
  0x1b   :  { %177 = vmatprep.subr.mxu0 %v289_v0  ;;  %209 = vmatprep.mubr.msk.f32.mxu0 %vm290_vm0, %v289_v0  ;;  %v68_v3 = vld [vmem:[#allocation5 + $0x68] sm:$0xff]  ;;  %v67_v4 = vld [vmem:[#allocation5 + $0x60] sm:$0xff]  ;;  %v66_v5 = vld [vmem:[#allocation5 + $0x58] sm:$0xff]  ;;  %s291_s24 = smov [#allocation7]  }
  0x1c   :  { %178 = vmatpush3.xpose.msra.mxu0 %v70_v1  ;;  %v65_v6 = vld [vmem:[#allocation5 + $0x50] sm:$0xff]  ;;  %v64_v7 = vld [vmem:[#allocation5 + $0x48] sm:$0xff]  ;;  %v63_v8 = vld [vmem:[#allocation5 + $0x40] sm:$0xff]  ;;  %s149_s25 = sshll.u32 %s291_s24, 4  ;;  %s150_s25 = int_to_ptr.vmem [resolvable:$true] %s149_s25 }
  0x1d   :  { %179 = vmatprep.subr.mxu0 %v289_v0  ;;  %v62_v9 = vld [vmem:[#allocation5 + $0x38] sm:$0xff]  ;;  %v61_v10 = vld [vmem:[#allocation5 + $0x30] sm:$0xff]  ;;  %v60_v11 = vld [vmem:[#allocation5 + $0x28] sm:$0xff]  ;;  %s259_s26 = scalar_lea.vmem %s150_s25, 128  ;;  %p264_p11 = scmp.lt.s32.totalorder %s150_s25, %s150_s25 }
  0x1e   :  { %v59_v12 = vld [vmem:[#allocation5 + $0x20] sm:$0xff]  ;;  %v58_v13 = vld [vmem:[#allocation5 + $0x18] sm:$0xff]  ;;  %v57_v14 = vld [vmem:[#allocation5 + $0x10] sm:$0xff]  ;;  %p260_p10 = scmp.ne.s32.totalorder %s150_s25, %s259_s26  ;;  %p265_p12 = scmp.lt.s32.totalorder %s259_s26, %s259_s26 }
  0x1f   :  { %v56_v15 = vld [vmem:[#allocation5 + $0x8] sm:$0xff]  ;;  %v55_v16 = vld [vmem:[#allocation5] sm:$0xff]  ;;  %v54_v17 = vld [vmem:[#allocation2] sm:$0xff] }
  0x20   :  { %180 = vmatpush3.xpose.msra.mxu0 %v69_v2  ;;  %v159_v18 = vld [vmem:[%s326_s2] ss:$0 sm:$0xff]  ;;  %p266_p13 = por %p265_p12, %p264_p11 }
  0x21   :  { %181 = vmatprep.subr.mxu0 %v289_v0 }
  0x22   :  { %p267_p0 = pnand %p266_p13, %p260_p10 }
  0x24   :  { %182 = vmatpush3.xpose.msra.mxu0 %v68_v3 }
  0x25   :  { %183 = vmatprep.subr.mxu0 %v289_v0 }
  0x28   :  { %184 = vmatpush3.xpose.msra.mxu0 %v67_v4 }
  0x29   :  { %185 = vmatprep.subr.mxu0 %v289_v0 }
  0x2c   :  { %186 = vmatpush3.xpose.msra.mxu0 %v66_v5 }
  0x2d   :  { %187 = vmatprep.subr.mxu0 %v289_v0 }
  0x30   :  { %188 = vmatpush3.xpose.msra.mxu0 %v65_v6 }
  0x31   :  { %189 = vmatprep.subr.mxu0 %v289_v0 }
  0x34   :  { %190 = vmatpush3.xpose.msra.mxu0 %v64_v7 }
  0x35   :  { %191 = vmatprep.subr.mxu0 %v289_v0 }
  0x38   :  { %192 = vmatpush3.xpose.msra.mxu0 %v63_v8 }
  0x39   :  { %193 = vmatprep.subr.mxu0 %v289_v0 }
  0x3c   :  { %194 = vmatpush3.xpose.msra.mxu0 %v62_v9 }
  0x3d   :  { %195 = vmatprep.subr.mxu0 %v289_v0 }
  0x40   :  { %196 = vmatpush3.xpose.msra.mxu0 %v61_v10 }
  0x41   :  { %197 = vmatprep.subr.mxu0 %v289_v0 }
  0x44   :  { %198 = vmatpush3.xpose.msra.mxu0 %v60_v11 }
  0x45   :  { %199 = vmatprep.subr.mxu0 %v289_v0 }
  0x48   :  { %200 = vmatpush3.xpose.msra.mxu0 %v59_v12 }
  0x49   :  { %201 = vmatprep.subr.mxu0 %v289_v0 }
  0x4c   :  { %202 = vmatpush3.xpose.msra.mxu0 %v58_v13 }
  0x4d   :  { %203 = vmatprep.subr.mxu0 %v289_v0 }
  0x50   :  { %204 = vmatpush3.xpose.msra.mxu0 %v57_v14 }
  0x51   :  { %205 = vmatprep.subr.mxu0 %v289_v0 }
  0x54   :  { %206 = vmatpush3.xpose.msra.mxu0 %v56_v15 }
  0x55   :  { %207 = vmatprep.subr.mxu0 %v289_v0 }
  0x58   :  { %208 = vmatpush3.xpose.msra.mxu0 %v55_v16 }
  0x5b   :  { %210 = vmatmul.mubr.f32.vlgmr.msra.gmra.mxu0 %v54_v17 }
 0x11b   :  { %v137_v19 = vpop.f32.mrf.mxu0 }
 0x11c   :  { %v141_v20 = vadd.f32 %v159_v18, %v137_v19 }
 0x11d   :  { %v211_v21 = vpop.f32.mrf.mxu0 }
 0x11e   :  { %142 = vst [vmem:[#allocation7] sm:$0xff] %v141_v20 }
 0x11f   :  { %270 = shalt.err (!%p267_p0)
}
 0x120   :  { %152 = dma.vmem_to_hbm [thread:$0]  %s150_s25, 128, %s327_s3, [#allocation4]  }
 0x121   :  { %283 = dma.done.wait [#allocation4], 128  }
 0x122   :  { %284 = vsyncadd [#allocation4], 4294967168 }
 0x123   :  { %156 = vsyncpa [#allocation3], 1 }
 0x124   :  { %157 = vsyncpa [#allocation6], 1 }
 0x125   :  { %158 = vsyncpa [#allocation4], 1 }

</bundles_post_ra>
